<compile_context>
chip_gen: v6e
topology: v6e:2x2x1
jax: 0.10.0
libtpu: 0.0.40
codegen_flags: <defaults>
</compile_context>

<pallas_src>
import jax
import jax.numpy as jnp
from jax.experimental import pallas as pl
from jax.experimental.pallas import tpu as pltpu


def _upsample_gemm_kernel(w_ref, b_ref, x_ref, o_ref):
    # w_ref: (4*O, 9*C)   b_ref: (4*O, 1)
    # x_ref: (1, 9*C, s_tile)   o_ref: (1, 4*O, s_tile)
    acc = jnp.dot(w_ref[...], x_ref[0], preferred_element_type=jnp.float32)
    o_ref[0] = (acc + b_ref[...]).astype(o_ref.dtype)


def _build_gemm_weight(weight):
    """Scatter ConvTranspose2d taps into a (4*O, 9*C) block-sparse GEMM weight.

    weight: PyTorch ConvTranspose2d layout (C_in, C_out, 4, 4).
    Row index   = (py*2 + px) * O + o    (output parity class, output channel)
    Column index = (a*3 + b) * C + c     (padded-input window offset, input channel)
    """
    C, O, KH, KW = weight.shape
    assert (KH, KW) == (4, 4)
    w_big = jnp.zeros((4 * O, 9 * C), weight.dtype)
    for py in range(2):
        for px in range(2):
            row0 = (py * 2 + px) * O
            for dy in range(2):
                for dx in range(2):
                    a, b = py + dy, px + dx              # padded-window offset
                    ky, kx = 3 - py - 2 * dy, 3 - px - 2 * dx
                    col0 = (a * 3 + b) * C
                    w_big = w_big.at[row0:row0 + O, col0:col0 + C].set(
                        weight[:, :, ky, kx].T)          # (O, C)
    return w_big


def _pick_spatial_tile(S):
    for t in (2048, 1024, 512, 256, 128):
        if S % t == 0:
            return t
    return S  # full extent (valid per the "equal full array dims" rule)


def upsample(x, weight, bias):
    """ConvTranspose2d(C, C, 4, 2, 1) forward pass.  x: (B, C, H, W) NCHW."""
    B, C, H, W = x.shape
    Cin, O, _, _ = weight.shape
    assert Cin == C
    S = H * W

    # im2col-lite: the 9 shifted (H, W) windows of the zero-padded input, with the
    # flattened spatial axis as the minor (lane) dimension.  Layout plumbing only.
    x_pad = jnp.pad(x, ((0, 0), (0, 0), (1, 1), (1, 1)))
    wins = [x_pad[:, :, a:a + H, b:b + W].reshape(B, C, S)
            for a in range(3) for b in range(3)]
    x_win = jnp.concatenate(wins, axis=1)                       # (B, 9*C, S)

    w_big = _build_gemm_weight(weight)                          # (4*O, 9*C)
    b_big = jnp.tile(bias, 4).reshape(4 * O, 1)                 # (4*O, 1)

    s_tile = _pick_spatial_tile(S)
    grid = (B, S // s_tile)

    flops = 2 * B * (4 * O) * (9 * C) * S
    bytes_accessed = 4 * (x_win.size + B * 4 * O * S + w_big.size + b_big.size)

    out_big = pl.pallas_call(
        _upsample_gemm_kernel,
        out_shape=jax.ShapeDtypeStruct((B, 4 * O, S), x.dtype),
        grid_spec=pltpu.PrefetchScalarGridSpec(
            num_scalar_prefetch=0,
            grid=grid,
            in_specs=[
                pl.BlockSpec((4 * O, 9 * C), lambda b, s: (0, 0)),
                pl.BlockSpec((4 * O, 1), lambda b, s: (0, 0)),
                pl.BlockSpec((1, 9 * C, s_tile), lambda b, s: (b, 0, s)),
            ],
            out_specs=pl.BlockSpec((1, 4 * O, s_tile), lambda b, s: (b, 0, s)),
        ),
        compiler_params=pltpu.CompilerParams(
            dimension_semantics=("parallel", "parallel")),
        cost_estimate=pl.CostEstimate(flops=flops, transcendentals=0,
                                      bytes_accessed=bytes_accessed),
    )(w_big, b_big, x_win)

    # Un-interleave the parity-blocked GEMM output back to NCHW:
    #   out[b, o, 2m+py, 2n+px] = out_big[b, (py*2+px)*O + o, m*W + n]
    out = out_big.reshape(B, 2, 2, O, H, W)
    out = jnp.transpose(out, (0, 3, 4, 1, 5, 2)).reshape(B, O, 2 * H, 2 * W)
    return out


def upsample_reference(x, weight, bias):
    """Plain-JAX/XLA reference for PyTorch ConvTranspose2d(C, C, 4, 2, 1)."""
    # ConvTranspose == lhs-dilated correlation with the spatially flipped kernel,
    # padding = kernel - 1 - padding = 2 on each side.
    w = jnp.transpose(jnp.flip(weight, axis=(2, 3)), (1, 0, 2, 3))  # (O, C, 4, 4)
    out = jax.lax.conv_general_dilated(
        x, w, window_strides=(1, 1), padding=[(2, 2), (2, 2)],
        lhs_dilation=(2, 2), rhs_dilation=(1, 1),
        dimension_numbers=("NCHW", "OIHW", "NCHW"))
    return out + bias.reshape(1, -1, 1, 1)


if __name__ == "__main__":
    # Small shapes consistent with the module (n_dims=2 path): NCHW input.
    B, C, H, W = 2, 4, 16, 16

    key = jax.random.PRNGKey(0)
    k_x, k_w, k_b = jax.random.split(key, 3)

    x = jax.random.normal(k_x, (B, C, H, W), dtype=jnp.float32)
    # PyTorch ConvTranspose2d weight layout: (in_channels, out_channels, kH, kW).
    weight = 0.1 * jax.random.normal(k_w, (C, C, 4, 4), dtype=jnp.float32)
    bias = 0.1 * jax.random.normal(k_b, (C,), dtype=jnp.float32)

    out = upsample(x, weight, bias)
    out = jax.block_until_ready(out)

    ref = upsample_reference(x, weight, bias)
    assert out.shape == (B, C, 2 * H, 2 * W), out.shape
    assert jnp.allclose(out, ref, atol=1e-4, rtol=1e-4), "mismatch vs reference"

    print("KERNEL_OK")
</pallas_src>

<mosaic_0001>
module attributes {stable_mosaic.version = 11 : i64} {
  func.func @_upsample_gemm_kernel(%arg0: i32, %arg1: i32, %arg2: memref<16x36xf32, #tpu.memory_space<vmem>>, %arg3: memref<16x1xf32, #tpu.memory_space<vmem>>, %arg4: memref<1x36x256xf32, #tpu.memory_space<vmem>>, %arg5: memref<1x16x256xf32, #tpu.memory_space<vmem>>) attributes {dimension_semantics = [#tpu.dimension_semantics<parallel>, #tpu.dimension_semantics<parallel>], iteration_bounds = array<i64: 2, 1>, scalar_prefetch = 0 : i64, scratch_operands = 0 : i64, tpu.core_type = #tpu.core_type<tc>, window_params = [{pipeline_mode = #tpu.pipeline_mode<synchronous>, transform_indices = @transform_0, window_bounds = array<i64: 16, 36>}, {pipeline_mode = #tpu.pipeline_mode<synchronous>, transform_indices = @transform_1, window_bounds = array<i64: 16, 1>}, {transform_indices = @transform_2, window_bounds = array<i64: 1, 36, 256>}, {transform_indices = @transform_3, window_bounds = array<i64: 1, 16, 256>}]} {
    %c0 = arith.constant 0 : index
    %c0_0 = arith.constant 0 : index
    %0 = vector.load %arg2[%c0, %c0_0] : memref<16x36xf32, #tpu.memory_space<vmem>>, vector<16x36xf32>
    %c0_1 = arith.constant 0 : index
    %c0_2 = arith.constant 0 : index
    %c0_3 = arith.constant 0 : index
    %1 = vector.load %arg4[%c0_1, %c0_2, %c0_3] : memref<1x36x256xf32, #tpu.memory_space<vmem>>, vector<1x36x256xf32>
    %2 = vector.shape_cast %1 : vector<1x36x256xf32> to vector<36x256xf32>
    %cst = arith.constant dense<0.000000e+00> : vector<16x256xf32>
    %3 = tpu.matmul %0, %2, %cst {dimension_numbers = #tpu.dot_dimension_numbers<[1], [0], [0], [1], [0, 0, 1, 1], [], []>} : vector<16x36xf32>, vector<36x256xf32>, vector<16x256xf32> -> vector<16x256xf32>
    %c0_4 = arith.constant 0 : index
    %c0_5 = arith.constant 0 : index
    %4 = vector.load %arg3[%c0_4, %c0_5] : memref<16x1xf32, #tpu.memory_space<vmem>>, vector<16x1xf32>
    %5 = vector.broadcast %4 : vector<16x1xf32> to vector<16x256xf32>
    %6 = arith.addf %3, %5 : vector<16x256xf32>
    %c0_6 = arith.constant 0 : index
    %c0_7 = arith.constant 0 : index
    %c0_8 = arith.constant 0 : index
    %7 = vector.load %arg5[%c0_6, %c0_7, %c0_8] : memref<1x16x256xf32, #tpu.memory_space<vmem>>, vector<1x16x256xf32>
    %8 = vector.shape_cast %7 : vector<1x16x256xf32> to vector<16x256xf32>
    %9 = vector.shape_cast %6 : vector<16x256xf32> to vector<1x16x256xf32>
    tpu.vector_store %arg5[%c0_6, %c0_7, %c0_8], %9 {strides = array<i32>} : memref<1x16x256xf32, #tpu.memory_space<vmem>>, vector<1x16x256xf32>,
    return
  }
  func.func @transform_0(%arg0: i32, %arg1: i32) -> (i32, i32) {
    %c0_i32 = arith.constant 0 : i32
    %c0_i32_0 = arith.constant 0 : i32
    %c0_i32_1 = arith.constant 0 : i32
    return %c0_i32, %c0_i32_0 : i32, i32
  }
  func.func @transform_1(%arg0: i32, %arg1: i32) -> (i32, i32) {
    %c0_i32 = arith.constant 0 : i32
    %c0_i32_0 = arith.constant 0 : i32
    %c0_i32_1 = arith.constant 0 : i32
    return %c0_i32, %c0_i32_0 : i32, i32
  }
  func.func @transform_2(%arg0: i32, %arg1: i32) -> (i32, i32, i32) {
    %c0_i32 = arith.constant 0 : i32
    %c0_i32_0 = arith.constant 0 : i32
    return %arg0, %c0_i32, %arg1 : i32, i32, i32
  }
  func.func @transform_3(%arg0: i32, %arg1: i32) -> (i32, i32, i32) {
    %c0_i32 = arith.constant 0 : i32
    %c0_i32_0 = arith.constant 0 : i32
    return %arg0, %c0_i32, %arg1 : i32, i32, i32
  }
}

</mosaic_0001>

<bundles_post_ra>
// kernel: tpu_custom_call.1
= control target key start
LH: loop header
LB: loop body
LE: loop exit
PB: predicated region body
PF: predicated region fallthrough
CT: control target
= control target key end

     0   :  { %8 = vsyncpa [#allocation3], 0  ;;  %s731_s0 = inlined_call_operand.vmem [shape: f32[16,36], index: 0, kind: input, shape index: {}]   ;;  %s732_s1 = inlined_call_operand.vmem [shape: f32[16,1], index: 1, kind: input, shape index: {}]   ;;  %s733_s2 = inlined_call_operand.vmem [shape: f32[2,36,256], index: 2, kind: input, shape index: {}]   ;;  %s734_s3 = inlined_call_operand.hbm [shape: f32[2,16,256], index: 3, kind: output, shape index: {}]  }
   0x1   :  { %10 = vsyncpa [#allocation3 + $0x1], 0  ;;  %s605_s12 = smov 0   ;;  %s607_s13 = smov 0  }
   0x2   :  { %s609_s14 = smov 0   ;;  %s611_s15 = smov 0  }
   0x3   :  { %s613_s16 = smov 0   ;;  %s615_s17 = smov 0  }
   0x4 LB: > { %s414_s18 = sadd.s32 4294967295, %s578_s17   ;;  %s415_s19 = sadd.s32 4294967294, %s578_s17   ;;  %s578_s17 = sphi %s615_s17, %s16_s17   ;;  %s574_s16 = sphi %s613_s16, %s741_s16   ;;  %s570_s15 = sphi %s611_s15, %s740_s15   ;;  %s566_s14 = sphi %s609_s14, %s739_s14   ;;  %s562_s13 = sphi %s607_s13, %s738_s13   ;;  %s558_s12 = sphi %s605_s12, %s737_s12  }
   0x5   : > { %s28_s20 = sadd.s32 1, %s574_s16  ;;  %s107_s21 = sadd.s32 1, %s566_s14 }
   0x6   : > { %p30_p0 = scmp.ge.s32.totalorder %s28_s20, 2  ;;  %p117_p1 = scmp.ne.s32.totalorder %s566_s14, %s562_s13 }
   0x7   : > { %p118_p2 = scmp.eq.s32.totalorder %s414_s18, 1  ;;  %p123_p3 = scmp.ne.s32.totalorder %s562_s13, %s558_s12 }
   0x8   : > { %s743_s20 = smov (%p30_p0, %s28_s20), 0  ;;  %p124_p5 = scmp.eq.s32.totalorder %s415_s19, 1 }
   0x9   : > { %p645_p4 = por %p118_p2, %p117_p1  ;;  %s102_s23 = ssub.s32 %s574_s16, %s743_s20 }
   0xa   : > { %p418_p6 = scmp.ge.s32.totalorder %s578_s17, 1  ;;  %p105_p7 = scmp.eq.s32.totalorder %s102_s23, 0 }
   0xb   : > { %p652_p8 = por %p124_p5, %p123_p3  ;;  %p161_p9 = scmp.lt.s32.totalorder %s578_s17, 3 }
   0xc   : > { %s658_s25 = scalar_select %p105_p7, %s566_s14, %s107_s21  }
   0xd   : > { %p162_p10 = pnand %p418_p6, %p161_p9 }
   0xe   : > { %p190_p11 = scmp.lt.s32.totalorder (!%p162_p10), %s570_s15, 1  ;;  %s186_s18 = sand.u32 (!%p162_p10), 1, %s562_s13  }
   0xf   : > { %165 = sbr.rel (%p162_p10) target bundleno = 248 (0xf8), region = 32  ;;  %s419_s19 = sshll.u32 (!%p162_p10), %s186_s18, 5 }
  0x10   : > { %s188_s21 = scalar_lea.vmem (!%p162_p10), [#allocation2], %s419_s19  ;;  %s430_s26 = sshll.u32 (!%p162_p10), %s570_s15, 9 }
  0x11   : > { %s335_s23 = sshll.u32 (!%p162_p10), %s188_s21, 4  ;;  %s582_s4 = smov (!%p162_p10), [#allocation2]   ;;  %s679_s23 = int_to_ptr.vmem [resolvable:$true] %s335_s23 }
  0x12   : > { %s502_s30 = scalar_lea.vmem (!%p162_p10), %s679_s23, 512  ;;  %s506_s5 = sshll.u32 (!%p162_p10), %s582_s4, 4  ;;  %s507_s5 = int_to_ptr.vmem [resolvable:$false] %s506_s5 }
  0x13   : > { %p503_p12 = scmp.ne.s32.totalorder (!%p162_p10), %s679_s23, %s502_s30  ;;  %s508_s6 = scalar_lea.vmem (!%p162_p10), %s507_s5, 1024 }
  0x14   : > { %v580_v0 = vmov 0.0   ;;  %v212_v1 = vld [vmem:[%s732_s1] sm:$0xff]  ;;  %s191_s28 = scalar_select %p190_p11, %s570_s15, 1  ;;  %v581_v2 = vmov 0   ;;  %v213_v3 = vld [vmem:[%s732_s1 + $0x8] sm:$0xff]  ;;  %vm231_vm0 = vcmask 1043456  }
  0x15   : > { %302 = vmatprep.mubr.f32.mxu0 %v580_v0  ;;  %308 = vmatprep.mubr.f32.mxu1 %v580_v0  ;;  %v200_v14 = vld [vmem:[%s731_s0] sm:$0xff]  ;;  %vm224_vm1 = vcmask 293888   ;;  %v201_v15 = vld [vmem:[%s731_s0 + $0x8] sm:$0xff]  ;;  %s686_s15 = scalar_lea.sflag [#allocation3], %s186_s18  ;;  %p504_p13 = pnand %p503_p12, %p645_p4 }
  0x16   : > { %501 = vset.pattern.permute.xlu0 %v581_v2  ;;  %s441_s29 = smul.u32 80, %s191_s28  ;;  %p509_p1 = scmp.lt.s32.totalorder %s679_s23, %s507_s5 }
  0x17   : > { %216 = vperm.xlu0 %501, %v212_v1   ;;  %p505_p0 = pneg %p504_p13  ;;  %p510_p2 = scmp.lt.s32.totalorder %s508_s6, %s502_s30 }
  0x18   : > { %s197_s7 = scalar_lea.vmem %s733_s2, %s441_s29  ;;  %s684_s29 = scalar_lea.hbm %s734_s3, %s430_s26 }
  0x19   : > { %v211_v4 = vld [vmem:[%s197_s7 + $0x48] sm:$0xf]  ;;  %v210_v5 = vld [vmem:[%s197_s7 + $0x40] sm:$0xf]  ;;  %v209_v6 = vld [vmem:[%s197_s7 + $0x38] sm:$0xff]  ;;  %p511_p3 = por %p510_p2, %p509_p1 }
  0x1a   : > { %421 = vmatprep.subr.msk.mxu0 %vm231_vm0, %v211_v4  ;;  %431 = vmatprep.subr.msk.mxu1 %vm231_vm0, %v211_v4  ;;  %v208_v7 = vld [vmem:[%s197_s7 + $0x30] sm:$0xff]  ;;  %v207_v8 = vld [vmem:[%s197_s7 + $0x28] sm:$0xff]  ;;  %v206_v9 = vld [vmem:[%s197_s7 + $0x20] sm:$0xff] }
  0x1b   : > { %221 = vperm.xlu0 %501, %v213_v3   ;;  %422 = vmatpush1.msk.msra.mxu0 %vm231_vm0, %v210_v5  ;;  %v205_v10 = vld [vmem:[%s197_s7 + $0x18] sm:$0xff]  ;;  %v204_v11 = vld [vmem:[%s197_s7 + $0x10] sm:$0xff]  ;;  %v203_v12 = vld [vmem:[%s197_s7 + $0x8] sm:$0xff]  ;;  %p512_p5 = pnand %p511_p3, %p505_p0 }
  0x1c   : > { %436 = vmatpush1.msk.msra.mxu1 %vm231_vm0, %v210_v5  ;;  %262 = vmatprep.subr.mxu0 %v209_v6  ;;  %v202_v13 = vld [vmem:[%s197_s7] sm:$0xff] }
  0x1d   : > { %432 = vmatprep.subr.mxu1 %v209_v6  ;;  %263 = vmatpush1.msra.mxu0 %v208_v7 }
  0x1e   : > { %437 = vmatpush1.msra.mxu1 %v208_v7  ;;  %264 = vmatprep.subr.mxu0 %v207_v8 }
  0x1f   : > { %433 = vmatprep.subr.mxu1 %v207_v8  ;;  %265 = vmatpush1.msra.mxu0 %v206_v9 }
  0x20   : > { %438 = vmatpush1.msra.mxu1 %v206_v9  ;;  %266 = vmatprep.subr.mxu0 %v205_v10 }
  0x21   : > { %434 = vmatprep.subr.mxu1 %v205_v10  ;;  %267 = vmatpush1.msra.mxu0 %v204_v11 }
  0x22   : > { %439 = vmatpush1.msra.mxu1 %v204_v11  ;;  %268 = vmatprep.subr.mxu0 %v203_v12 }
  0x23   : > { %435 = vmatprep.subr.mxu1 %v203_v12  ;;  %269 = vmatpush1.msra.mxu0 %v202_v13 }
  0x24   : > { %440 = vmatpush1.msra.mxu1 %v202_v13  ;;  %423 = vmatmul.mubr.msk.f32.vlgmr.msra.gmra.mxu0 %vm224_vm1, %v200_v14 }
  0x25   : > { %424 = vmatmul.mubr.msk.f32.vlgmr.msra.gmra.mxu1 %vm224_vm1, %v201_v15 }
  0x92   : > { %v217_v16 = vpop.permute.xlu0 %216 }
  0x96   : > { %v222_v17 = vpop.permute.xlu0 %221 }
  0xe4   : > { %v304_v18 = vpop.f32.mrf.mxu0 }
  0xe5   : > { %v310_v19 = vpop.f32.mrf.mxu1  ;;  %v305_v20 = vadd.f32 %v304_v18, %v217_v16 }
  0xe6   : > { %v311_v21 = vadd.f32 %v310_v19, %v222_v17  ;;  %v306_v22 = vpop.f32.mrf.mxu0 }
  0xe7   : > { %v312_v23 = vpop.f32.mrf.mxu1  ;;  %315 = vst [vmem:[%s188_s21] sm:$0xff] %v305_v20  ;;  %v307_v24 = vadd.f32 %v306_v22, %v217_v16 }
  0xe8   : > { %317 = vst [vmem:[%s188_s21 + $0x10] sm:$0xff] %v311_v21  ;;  %v313_v25 = vadd.f32 %v312_v23, %v222_v17 }
  0xe9   : > { %316 = vst [vmem:[%s188_s21 + $0x8] sm:$0xff] %v307_v24 }
  0xea   : > { %318 = vst [vmem:[%s188_s21 + $0x18] sm:$0xff] %v313_v25 }
  0xeb   : > { %515 = shalt.err (!%p512_p5)
}
  0xec   : > { %s516_s7 = scalar_lea.hbm %s684_s29, 512  ;;  %s520_s10 = scalar_lea.hbm %s734_s3, 1024 }
  0xed   : > { %p517_p6 = scmp.ne.s32.totalorder %s684_s29, %s516_s7  ;;  %p521_p10 = scmp.lt.s32.totalorder %s684_s29, %s734_s3 }
  0xee   : > { %p522_p11 = scmp.lt.s32.totalorder %s520_s10, %s516_s7 }
  0xef   : > { %p518_p7 = pnand %p517_p6, %p645_p4 }
  0xf0   : > { %p523_p12 = por %p522_p11, %p521_p10 }
  0xf1   : > { %p519_p9 = pneg %p518_p7 }
  0xf3   : > { %p524_p13 = pnand %p523_p12, %p519_p9 }
  0xf5   : > { %527 = shalt.err (!%p524_p13)
}
  0xf6   : > { %s583_s19 = smov 256   ;;  %s584_s21 = smov 16  }
  0xf7   : > { %442 = dma.vmem_to_hbm [thread:$0]  (%p645_p4), %s679_s23, 512, %s684_s29, %s686_s15, %s583_s19, %s583_s19, %s584_s21  }
  0xf8 PF: > { %p448_p0 = scmp.ge.s32.totalorder %s578_s17, 2  ;;  %s350_s26 = sand.u32 1, %s558_s12  }
  0xf9   : > { %s351_s27 = scalar_lea.sflag [#allocation3], %s350_s26 }
  0xfa   : > { %p445_p1 = pnand %p448_p0, %p652_p8 }
  0xfc   : > { %p446_p2 = pneg %p445_p1 }
  0xfe   : > { %553 = dma.done.wait (%p446_p2), %s351_s27, 512  }
  0xff   : > { %555 = vsyncadd (%p446_p2), %s351_s27, 4294966784  ;;  %s16_s17 = sadd.s32 1, %s578_s17   ;;  %s737_s12 = smov %s562_s13 }
 0x100   : > { %p13_p3 = scmp.ge.s32.totalorder %s16_s17, 4   ;;  %s738_s13 = smov %s566_s14 }
 0x101   : > { %s739_s14 = smov %s658_s25  ;;  %s740_s15 = smov %s574_s16 }
 0x102   : > { %s741_s16 = smov %s743_s20  ;;  %15 = sbr.rel (!%p13_p3) target bundleno = 4 (0x4), region = 67 }
 0x107   :  { %356 = vsyncpa [#allocation3], 1 }
 0x108   :  { %358 = vsyncpa [#allocation3 + $0x1], 1 }

</bundles_post_ra>
